<compile_context>
chip_gen: v7x
topology: tpu7x:2x2x1
jax: 0.10.0
libtpu: 0.0.40
codegen_flags: <defaults>
</compile_context>

<pallas_src>
import jax
import jax.numpy as jnp
from jax.experimental import pallas as pl
from jax.experimental.pallas import tpu as pltpu

INPUT_DIM = 16
H1 = 42
H2 = 35
OUT = 1
LANE = 128
MAX_TB = 4096     # per-grid-step batch tile cap (256 KiB of x; VMEM is a non-issue)
SUB = 256         # rows per in-register sub-tile of the fused chain


def _cdiv(a, b):
    return (a + b - 1) // b


def _round_up(n, m):
    return _cdiv(n, m) * m


def make_mlp_kernel(tb, sub):
    """Fused 3-layer MLP forward on one (tb, D) batch tile.

    Weights are in PyTorch-native [out, in] layout; the chain is computed in
    transposed orientation (features on sublanes, batch on lanes), so all
    matmuls are native [M,K]@[K,N] and the output is a lane-dense (1, tb) slab.
    """
    n_sub = tb // sub
    assert n_sub * sub == tb

    def kernel(x_ref, w1_ref, b1_ref, w2_ref, b2_ref, w3_ref, b3_ref, o_ref):
        w1 = w1_ref[...]                                   # (H1, D)
        w2 = w2_ref[...]                                   # (H2, H1)
        w3 = w3_ref[...]                                   # (OUT, H2)
        # Hoisted lane-broadcasts of the biases (kept live across the loop;
        # ~23 vregs at sub=256, well within budget together with the weights).
        b1c = jnp.broadcast_to(b1_ref[...], (H1, sub))     # (H1, sub)
        b2c = jnp.broadcast_to(b2_ref[...], (H2, sub))     # (H2, sub)
        b3c = jnp.broadcast_to(b3_ref[...], (OUT, sub))    # (1, sub)

        def body(s, carry):
            r = pl.multiple_of(s * sub, sub)
            x = x_ref[pl.ds(r, sub), :]                    # (sub, D) row-major slice
            # Layer 1: contract the feature axis of both operands -> the
            # transposed activation (H1, sub) directly (no x transpose pass).
            h1 = jax.lax.dot_general(
                w1, x, (((1,), (1,)), ((), ())),
                preferred_element_type=jnp.float32)        # (H1, sub)
            h1 = jnp.maximum(h1 + b1c, 0.0)                # ReLU
            # Layer 2: native [H2,H1] @ [H1,sub].
            h2 = jnp.dot(w2, h1, preferred_element_type=jnp.float32)  # (H2, sub)
            h2 = jnp.maximum(h2 + b2c, 0.0)                # ReLU
            # Dropout(0.4896) -> identity at inference time.
            # Layer 3: native [1,H2] @ [H2,sub] -> lane-dense (1, sub).
            o = jnp.dot(w3, h2, preferred_element_type=jnp.float32) + b3c
            o_ref[:, pl.ds(r, sub)] = o.astype(o_ref.dtype)
            return carry

        jax.lax.fori_loop(0, n_sub, body, 0, unroll=True)

    return kernel


def _pick_tb(B):
    """Batch-tile heuristic.

    Large, lane-aligned tiles (up to MAX_TB) amortize the per-grid-step
    pipeline overhead; any B > 128 gets an even number of >= 2 grid steps so
    both v7x TensorCores are used on the "parallel" batch axis.
    """
    if B <= LANE:
        return LANE
    steps = 2 * _cdiv(B, 2 * MAX_TB)        # smallest even step count with tb <= MAX_TB
    return _round_up(_cdiv(B, steps), LANE)


def binary_classification_forward(x, params, *, tb=None):
    """x: [B, INPUT_DIM] float32; params in PyTorch-native layouts (see init_params)."""
    B, D = x.shape
    assert D == INPUT_DIM
    if tb is None:
        tb = _pick_tb(B)
    assert tb % LANE == 0, "batch tile must be a multiple of 128 (lane width)"
    sub = SUB if tb % SUB == 0 else LANE

    # Pad the batch to a multiple of the tile; padded rows are sliced off below.
    Bp = _round_up(B, tb)
    if Bp != B:
        x = jnp.pad(x, ((0, Bp - B), (0, 0)))

    w1, b1, w2, b2, w3, b3 = (params[k] for k in ("w1", "b1", "w2", "b2", "w3", "b3"))

    grid = (Bp // tb,)
    # Weights/biases are tiny and identical every step (constant index_map),
    # so they are DMA'd once; no per-step traffic.
    const = lambda i: (0, 0)
    out = pl.pallas_call(
        make_mlp_kernel(tb, sub),
        out_shape=jax.ShapeDtypeStruct((1, Bp), jnp.float32),
        grid_spec=pltpu.PrefetchScalarGridSpec(
            num_scalar_prefetch=0,
            grid=grid,
            in_specs=[
                pl.BlockSpec((tb, D), lambda i: (i, 0)),   # x batch tile
                pl.BlockSpec((H1, D), const),              # w1  [out, in]
                pl.BlockSpec((H1, 1), const),              # b1  column
                pl.BlockSpec((H2, H1), const),             # w2  [out, in]
                pl.BlockSpec((H2, 1), const),              # b2  column
                pl.BlockSpec((OUT, H2), const),            # w3  [out, in] (lane-dense row)
                pl.BlockSpec((OUT, 1), const),             # b3
            ],
            out_specs=pl.BlockSpec((1, tb), lambda i: (0, i)),  # lane-dense slab
        ),
        compiler_params=pltpu.CompilerParams(
            dimension_semantics=("parallel",),
        ),
    )(x, w1, b1, w2, b2, w3, b3)

    # (1, Bp) lane-dense slab -> (B, 1) column; reshape/slice is free plumbing.
    return out.reshape(Bp, 1)[:B]


def init_params(key):
    """Deterministic init mimicking torch.nn.Linear default (U[-1/sqrt(fan_in), +]).

    Weights kept in PyTorch-native [out, in] layout; biases as [out, 1] columns.
    """
    ks = jax.random.split(key, 6)

    def lin(kw, kb, fan_in, w_shape, b_shape):
        bound = 1.0 / jnp.sqrt(jnp.float32(fan_in))
        w = jax.random.uniform(kw, w_shape, jnp.float32, -bound, bound)
        b = jax.random.uniform(kb, b_shape, jnp.float32, -bound, bound)
        return w, b

    w1, b1 = lin(ks[0], ks[1], INPUT_DIM, (H1, INPUT_DIM), (H1, 1))
    w2, b2 = lin(ks[2], ks[3], H1, (H2, H1), (H2, 1))
    w3, b3 = lin(ks[4], ks[5], H2, (OUT, H2), (OUT, 1))
    return dict(w1=w1, b1=b1, w2=w2, b2=b2, w3=w3, b3=b3)


def reference_forward(x, p):
    h1 = jnp.maximum(x @ p["w1"].T + p["b1"].T, 0.0)
    h2 = jnp.maximum(h1 @ p["w2"].T + p["b2"].T, 0.0)
    return h2 @ p["w3"].T + p["b3"].T


if __name__ == "__main__":
    key = jax.random.PRNGKey(0)
    kx, kp = jax.random.split(key)
    params = init_params(kp)

    # B=8:    single 128-row tile (padded), grid=1, one sub-tile.
    # B=200:  tb=128, grid=2 (even-step / dual-TC path), padded tail.
    # B=512:  tb=256, grid=2, sub=256.
    # B=1500: tb=768, grid=2, 3 unrolled 256-row sub-tiles per step.
    for B in (8, 200, 512, 1500):
        x = jax.random.normal(jax.random.fold_in(kx, B), (B, INPUT_DIM), jnp.float32)
        out = jax.block_until_ready(binary_classification_forward(x, params))
        ref = reference_forward(x, params)
        assert out.shape == (B, OUT), out.shape
        assert jnp.allclose(out, ref, atol=5e-5, rtol=5e-5), (
            f"mismatch vs reference at B={B}: "
            f"max abs err {float(jnp.max(jnp.abs(out - ref)))}")

    print("KERNEL_OK")
</pallas_src>

<mosaic_0001>
module attributes {stable_mosaic.version = 11 : i64} {
  func.func @kernel(%arg0: i32, %arg1: memref<128x16xf32, #tpu.memory_space<vmem>>, %arg2: memref<42x16xf32, #tpu.memory_space<vmem>>, %arg3: memref<42x1xf32, #tpu.memory_space<vmem>>, %arg4: memref<35x42xf32, #tpu.memory_space<vmem>>, %arg5: memref<35x1xf32, #tpu.memory_space<vmem>>, %arg6: memref<1x35xf32, #tpu.memory_space<vmem>>, %arg7: memref<1x1xf32, #tpu.memory_space<vmem>>, %arg8: memref<1x128xf32, #tpu.memory_space<vmem>>) attributes {dimension_semantics = [#tpu.dimension_semantics<parallel>], iteration_bounds = array<i64: 1>, scalar_prefetch = 0 : i64, scratch_operands = 0 : i64, tpu.core_type = #tpu.core_type<tc>, window_params = [{transform_indices = @transform_0, window_bounds = array<i64: 128, 16>}, {pipeline_mode = #tpu.pipeline_mode<synchronous>, transform_indices = @transform_1, window_bounds = array<i64: 42, 16>}, {pipeline_mode = #tpu.pipeline_mode<synchronous>, transform_indices = @transform_2, window_bounds = array<i64: 42, 1>}, {pipeline_mode = #tpu.pipeline_mode<synchronous>, transform_indices = @transform_3, window_bounds = array<i64: 35, 42>}, {pipeline_mode = #tpu.pipeline_mode<synchronous>, transform_indices = @transform_4, window_bounds = array<i64: 35, 1>}, {pipeline_mode = #tpu.pipeline_mode<synchronous>, transform_indices = @transform_5, window_bounds = array<i64: 1, 35>}, {pipeline_mode = #tpu.pipeline_mode<synchronous>, transform_indices = @transform_6, window_bounds = array<i64: 1, 1>}, {transform_indices = @transform_7, window_bounds = array<i64: 1, 128>}]} {
    %c0 = arith.constant 0 : index
    %c0_0 = arith.constant 0 : index
    %0 = vector.load %arg2[%c0, %c0_0] : memref<42x16xf32, #tpu.memory_space<vmem>>, vector<42x16xf32>
    %c0_1 = arith.constant 0 : index
    %c0_2 = arith.constant 0 : index
    %1 = vector.load %arg4[%c0_1, %c0_2] : memref<35x42xf32, #tpu.memory_space<vmem>>, vector<35x42xf32>
    %c0_3 = arith.constant 0 : index
    %c0_4 = arith.constant 0 : index
    %2 = vector.load %arg6[%c0_3, %c0_4] : memref<1x35xf32, #tpu.memory_space<vmem>>, vector<1x35xf32>
    %c0_5 = arith.constant 0 : index
    %c0_6 = arith.constant 0 : index
    %3 = vector.load %arg3[%c0_5, %c0_6] : memref<42x1xf32, #tpu.memory_space<vmem>>, vector<42x1xf32>
    %4 = vector.shape_cast %3 : vector<42x1xf32> to vector<42x1xf32>
    %5 = vector.broadcast %4 : vector<42x1xf32> to vector<42x128xf32>
    %c0_7 = arith.constant 0 : index
    %c0_8 = arith.constant 0 : index
    %6 = vector.load %arg5[%c0_7, %c0_8] : memref<35x1xf32, #tpu.memory_space<vmem>>, vector<35x1xf32>
    %7 = vector.shape_cast %6 : vector<35x1xf32> to vector<35x1xf32>
    %8 = vector.broadcast %7 : vector<35x1xf32> to vector<35x128xf32>
    %c0_9 = arith.constant 0 : index
    %c0_10 = arith.constant 0 : index
    %9 = vector.load %arg7[%c0_9, %c0_10] : memref<1x1xf32, #tpu.memory_space<vmem>>, vector<1x1xf32>
    %10 = vector.shape_cast %9 : vector<1x1xf32> to vector<1x1xf32>
    %11 = vector.broadcast %10 : vector<1x1xf32> to vector<1x128xf32>
    %c0_i32 = arith.constant 0 : i32
    %c128_i32 = arith.constant 128 : i32
    %12 = arith.muli %c0_i32, %c128_i32 : i32
    %13 = tpu.assume_multiple %12, 128 : i32
    %14 = arith.index_cast %13 : i32 to index
    %c0_11 = arith.constant 0 : index
    %15 = vector.load %arg1[%14, %c0_11] : memref<128x16xf32, #tpu.memory_space<vmem>>, vector<128x16xf32>
    %cst = arith.constant dense<0.000000e+00> : vector<42x128xf32>
    %16 = tpu.matmul %0, %15, %cst {dimension_numbers = #tpu.dot_dimension_numbers<[1], [1], [0], [0], [0, 0, 1, 0], [], []>} : vector<42x16xf32>, vector<128x16xf32>, vector<42x128xf32> -> vector<42x128xf32>
    %17 = arith.addf %16, %5 : vector<42x128xf32>
    %cst_12 = arith.constant 0.000000e+00 : f32
    %18 = vector.broadcast %cst_12 : f32 to vector<42x128xf32>
    %19 = arith.maximumf %17, %18 : vector<42x128xf32>
    %cst_13 = arith.constant dense<0.000000e+00> : vector<35x128xf32>
    %20 = tpu.matmul %1, %19, %cst_13 {dimension_numbers = #tpu.dot_dimension_numbers<[1], [0], [0], [1], [0, 0, 1, 1], [], []>} : vector<35x42xf32>, vector<42x128xf32>, vector<35x128xf32> -> vector<35x128xf32>
    %21 = arith.addf %20, %8 : vector<35x128xf32>
    %cst_14 = arith.constant 0.000000e+00 : f32
    %22 = vector.broadcast %cst_14 : f32 to vector<35x128xf32>
    %23 = arith.maximumf %21, %22 : vector<35x128xf32>
    %cst_15 = arith.constant dense<0.000000e+00> : vector<1x128xf32>
    %24 = tpu.matmul %2, %23, %cst_15 {dimension_numbers = #tpu.dot_dimension_numbers<[1], [0], [0], [1], [0, 0, 1, 1], [], []>} : vector<1x35xf32>, vector<35x128xf32>, vector<1x128xf32> -> vector<1x128xf32>
    %25 = arith.addf %24, %11 : vector<1x128xf32>
    %c0_16 = arith.constant 0 : index
    %26 = arith.index_cast %13 : i32 to index
    %27 = vector.load %arg8[%c0_16, %26] : memref<1x128xf32, #tpu.memory_space<vmem>>, vector<1x128xf32>
    tpu.vector_store %arg8[%c0_16, %26], %25 {strides = array<i32>} : memref<1x128xf32, #tpu.memory_space<vmem>>, vector<1x128xf32>,
    %c1_i32 = arith.constant 1 : i32
    return
  }
  func.func @transform_0(%arg0: i32) -> (i32, i32) {
    %c0_i32 = arith.constant 0 : i32
    %c0_i32_0 = arith.constant 0 : i32
    return %arg0, %c0_i32 : i32, i32
  }
  func.func @transform_1(%arg0: i32) -> (i32, i32) {
    %c0_i32 = arith.constant 0 : i32
    %c0_i32_0 = arith.constant 0 : i32
    %c0_i32_1 = arith.constant 0 : i32
    return %c0_i32, %c0_i32_0 : i32, i32
  }
  func.func @transform_2(%arg0: i32) -> (i32, i32) {
    %c0_i32 = arith.constant 0 : i32
    %c0_i32_0 = arith.constant 0 : i32
    %c0_i32_1 = arith.constant 0 : i32
    return %c0_i32, %c0_i32_0 : i32, i32
  }
  func.func @transform_3(%arg0: i32) -> (i32, i32) {
    %c0_i32 = arith.constant 0 : i32
    %c0_i32_0 = arith.constant 0 : i32
    %c0_i32_1 = arith.constant 0 : i32
    return %c0_i32, %c0_i32_0 : i32, i32
  }
  func.func @transform_4(%arg0: i32) -> (i32, i32) {
    %c0_i32 = arith.constant 0 : i32
    %c0_i32_0 = arith.constant 0 : i32
    %c0_i32_1 = arith.constant 0 : i32
    return %c0_i32, %c0_i32_0 : i32, i32
  }
  func.func @transform_5(%arg0: i32) -> (i32, i32) {
    %c0_i32 = arith.constant 0 : i32
    %c0_i32_0 = arith.constant 0 : i32
    %c0_i32_1 = arith.constant 0 : i32
    return %c0_i32, %c0_i32_0 : i32, i32
  }
  func.func @transform_6(%arg0: i32) -> (i32, i32) {
    %c0_i32 = arith.constant 0 : i32
    %c0_i32_0 = arith.constant 0 : i32
    %c0_i32_1 = arith.constant 0 : i32
    return %c0_i32, %c0_i32_0 : i32, i32
  }
  func.func @transform_7(%arg0: i32) -> (i32, i32) {
    %c0_i32 = arith.constant 0 : i32
    %c0_i32_0 = arith.constant 0 : i32
    return %c0_i32, %arg0 : i32, i32
  }
}

</mosaic_0001>

<bundles_post_ra>
// kernel: tpu_custom_call.1
= control target key start
LH: loop header
LB: loop body
LE: loop exit
PB: predicated region body
PF: predicated region fallthrough
CT: control target
= control target key end

     0   :  { %s995_s0 = inlined_call_operand.vmem [shape: f32[128,16], index: 0, kind: input, shape index: {}]   ;;  %s996_s1 = inlined_call_operand.vmem [shape: f32[42,16], index: 1, kind: input, shape index: {}]   ;;  %s997_s2 = inlined_call_operand.vmem [shape: f32[42,1], index: 2, kind: input, shape index: {}]   ;;  %s998_s3 = inlined_call_operand.vmem [shape: f32[35,42], index: 3, kind: input, shape index: {}]   ;;  %s999_s4 = inlined_call_operand.vmem [shape: f32[35,1], index: 4, kind: input, shape index: {}]   ;;  %s1000_s5 = inlined_call_operand.vmem [shape: f32[1,35], index: 5, kind: input, shape index: {}]   ;;  %s1001_s6 = inlined_call_operand.<no memory space> [shape: f32[1,1], index: 6, kind: input, shape index: {}]   ;;  %s1002_s7 = inlined_call_operand.hbm [shape: f32[1,128], index: 7, kind: output, shape index: {}]  }
   0x1   :  { %v12_v0 = vstv %s1001_s6 }
   0x2   :  { %13 = vst [vmem:[#allocation2] sm:$0x1] %v12_v0 }
   0x3   :  { %v117_v1 = vld [vmem:[%s995_s0] sm:$0xff]  ;;  %v118_v2 = vld [vmem:[%s995_s0 + $0x8] sm:$0xff]  ;;  %vm133_vm0 = vcmask 130048   ;;  %v119_v3 = vld [vmem:[%s995_s0 + $0x10] sm:$0xff]  ;;  %v755_v7 = vmov 0  }
   0x4   :  { %v659_v4 = vpack.c.bf16 %v118_v2, %v117_v1  ;;  %vm815_vm1 = vmpackc.low %vm133_vm0, %vm133_vm0  ;;  %v120_v6 = vld [vmem:[%s995_s0 + $0x18] sm:$0xff]  ;;  %729 = vset.pattern.permute.xlu0 %v755_v7  ;;  %730 = vset.pattern.permute.xlu1 %v755_v7  ;;  %v29_v9 = vld [vmem:[%s996_s1] sm:$0xff] }
   0x5   :  { %v665_v8 = vpack.c.bf16 %v120_v6, %v119_v3  ;;  %v121_v10 = vld [vmem:[%s995_s0 + $0x20] sm:$0xff]  ;;  %v122_v11 = vld [vmem:[%s995_s0 + $0x28] sm:$0xff]  ;;  %610 = vmatprep.mubr.msk.f32.mxu0 %vm133_vm0, %v29_v9  ;;  %v43_v13 = vld [vmem:[%s997_s2 + $0x10] sm:$0xff] }
   0x6   :  { %661 = vmatprep.subr.msk.bf16.mxu0 %vm815_vm1, %v659_v4  ;;  %v41_v12 = vld [vmem:[%s997_s2] sm:$0xff]  ;;  %v671_v14 = vpack.c.bf16 %v122_v11, %v121_v10  ;;  %59 = vperm.xlu1 %730, %v43_v13   ;;  %v42_v15 = vld [vmem:[%s997_s2 + $0x8] sm:$0xff]  ;;  %v44_v16 = vld [vmem:[%s997_s2 + $0x18] sm:$0xff] }
   0x7   :  { %664 = vmatpush3.bf16.xpose.msk.msra.mxu0 %vm815_vm1, %v659_v4  ;;  %49 = vperm.xlu0 %729, %v41_v12  }
   0x8   :  { %667 = vmatprep.subr.msk.bf16.mxu0 %vm815_vm1, %v665_v8 }
   0x9   :  { %14 = vsyncpa [#allocation4], 0  ;;  %v45_v17 = vld [vmem:[%s997_s2 + $0x20] sm:$0xff]  ;;  %v123_v18 = vld [vmem:[%s995_s0 + $0x30] sm:$0xff]  ;;  %v756_v45 = vmov 0.0|0.0   ;;  %vm757_vm2 = vmmov 0  }
   0xa   :  { %64 = vperm.xlu1 %730, %v44_v16   ;;  %v124_v19 = vld [vmem:[%s995_s0 + $0x38] sm:$0xff]  ;;  %v46_v20 = vld [vmem:[%s997_s2 + $0x28] sm:$0x3]  ;;  %v77_v22 = vld [vmem:[%s999_s4] sm:$0xff]  ;;  %707 = vmatprep.subr.bf16.mxu1 %v756_v45  ;;  %v758_v46 = vmov 0.0   ;;  %vm317_vm3 = vcmask 1041408  }
   0xb   :  { %54 = vperm.xlu0 %729, %v42_v15   ;;  %v677_v21 = vpack.c.bf16 %v124_v19, %v123_v18  ;;  %v78_v23 = vld [vmem:[%s999_s4 + $0x8] sm:$0xff]  ;;  %v79_v24 = vld [vmem:[%s999_s4 + $0x10] sm:$0xff]  ;;  %v125_v25 = vld [vmem:[%s995_s0 + $0x40] sm:$0xff]  ;;  %631 = vmatprep.mubr.msk.f32.mxu1 %vm757_vm2, %v758_v46  ;;  %vm759_vm4 = vmmov 1   ;;  %vm301_vm6 = vcmask 343040   ;;  %vm420_vm7 = vcmask 1042432  }
   0xc   :  { %v126_v26 = vld [vmem:[%s995_s0 + $0x48] sm:$0xff]  ;;  %v80_v27 = vld [vmem:[%s999_s4 + $0x18] sm:$0xff]  ;;  %v81_v29 = vld [vmem:[%s999_s4 + $0x20] sm:$0x7]  ;;  %vm416_vm8 = vcmask 285696   ;;  %s760_s25 = smov [#allocation3]  }
   0xd   :  { %v683_v28 = vpack.c.bf16 %v126_v26, %v125_v25  ;;  %v107_v30 = vld [vmem:[#allocation2] sm:$0x1]  ;;  %v127_v31 = vld [vmem:[%s995_s0 + $0x50] sm:$0xff]  ;;  %v128_v32 = vld [vmem:[%s995_s0 + $0x58] sm:$0xff]  ;;  %s501_s26 = sshll.u32 %s760_s25, 4  ;;  %s502_s26 = int_to_ptr.vmem [resolvable:$true] %s501_s26 }
   0xe   :  { %74 = vperm.xlu1 %730, %v46_v20   ;;  %v689_v33 = vpack.c.bf16 %v128_v32, %v127_v31  ;;  %v129_v34 = vld [vmem:[%s995_s0 + $0x60] sm:$0xff]  ;;  %v130_v35 = vld [vmem:[%s995_s0 + $0x68] sm:$0xff]  ;;  %v131_v37 = vld [vmem:[%s995_s0 + $0x70] sm:$0xff]  ;;  %s731_s27 = scalar_lea.vmem %s502_s26, 16  ;;  %s735_s28 = scalar_lea.vmem %s502_s26, 32 }
   0xf   :  { %670 = vmatpush3.bf16.xpose.msk.msra.mxu0 %vm815_vm1, %v665_v8  ;;  %69 = vperm.xlu0 %729, %v45_v17   ;;  %v695_v36 = vpack.c.bf16 %v130_v35, %v129_v34  ;;  %v132_v38 = vld [vmem:[%s995_s0 + $0x78] sm:$0xff]  ;;  %v30_v40 = vld [vmem:[%s996_s1 + $0x8] sm:$0xff]  ;;  %v31_v41 = vld [vmem:[%s996_s1 + $0x10] sm:$0xff]  ;;  %p732_p0 = scmp.ne.s32.totalorder %s502_s26, %s731_s27  ;;  %p736_p1 = scmp.lt.s32.totalorder %s502_s26, %s502_s26 }
  0x10   :  { %673 = vmatprep.subr.msk.bf16.mxu0 %vm815_vm1, %v671_v14  ;;  %v701_v39 = vpack.c.bf16 %v132_v38, %v131_v37  ;;  %v32_v42 = vld [vmem:[%s996_s1 + $0x18] sm:$0xff]  ;;  %v33_v43 = vld [vmem:[%s996_s1 + $0x20] sm:$0xff]  ;;  %v34_v44 = vld [vmem:[%s996_s1 + $0x28] sm:$0x3]  ;;  %p737_p2 = scmp.lt.s32.totalorder %s735_s28, %s731_s27 }
  0x11   :  { %vm715_vm5 = vmpackc.low %vm317_vm3, %vm759_vm4  ;;  %v35_v10 = vld [vmem:[%s998_s3] sm:$0xff]  ;;  %v36_v11 = vld [vmem:[%s998_s3 + $0x8] sm:$0xff] }
  0x12   :  { %89 = vperm.xlu1 %730, %v78_v23   ;;  %v37_v12 = vld [vmem:[%s998_s3 + $0x10] sm:$0xff]  ;;  %v38_v13 = vld [vmem:[%s998_s3 + $0x18] sm:$0xff]  ;;  %p738_p3 = por %p737_p2, %p736_p1 }
  0x13   :  { %84 = vperm.xlu0 %729, %v77_v22  }
  0x14   :  { %p739_p4 = pnand %p738_p3, %p732_p0 }
  0x16   :  { %99 = vperm.xlu1 %730, %v80_v27  }
  0x17   :  { %676 = vmatpush3.bf16.xpose.msk.msra.mxu0 %vm815_vm1, %v671_v14  ;;  %94 = vperm.xlu0 %729, %v79_v24   ;;  %v39_v14 = vld [vmem:[%s998_s3 + $0x20] sm:$0x7] }
  0x18   :  { %679 = vmatprep.subr.msk.bf16.mxu0 %vm815_vm1, %v677_v21 }
  0x1a   :  { %110 = vperm.xlu1 %730, %v107_v30  }
  0x1b   :  { %104 = vperm.xlu0 %729, %v81_v29  }
  0x1f   :  { %682 = vmatpush3.bf16.xpose.msk.msra.mxu0 %vm815_vm1, %v677_v21 }
  0x20   :  { %685 = vmatprep.subr.msk.bf16.mxu0 %vm815_vm1, %v683_v28 }
  0x27   :  { %688 = vmatpush3.bf16.xpose.msk.msra.mxu0 %vm815_vm1, %v683_v28 }
  0x28   :  { %691 = vmatprep.subr.msk.bf16.mxu0 %vm815_vm1, %v689_v33 }
  0x2f   :  { %694 = vmatpush3.bf16.xpose.msk.msra.mxu0 %vm815_vm1, %v689_v33 }
  0x30   :  { %697 = vmatprep.subr.msk.bf16.mxu0 %vm815_vm1, %v695_v36 }
  0x37   :  { %700 = vmatpush3.bf16.xpose.msk.msra.mxu0 %vm815_vm1, %v695_v36 }
  0x38   :  { %703 = vmatprep.subr.msk.bf16.mxu0 %vm815_vm1, %v701_v39 }
  0x3f   :  { %706 = vmatpush3.bf16.xpose.msk.msra.mxu0 %vm815_vm1, %v701_v39 }
  0x46   :  { %611 = vmatmul.mubr.msk.f32.vlgmr.msra.gmra.mrb[0].mxu0 %vm133_vm0, %v30_v40 }
  0x47   :  { %613 = vmatprep.mubr.msk.f32.mxu0 %vm133_vm0, %v31_v41 }
  0x4a   :  { %614 = vmatmul.mubr.msk.f32.gmra.mrb[2].mxu0 %vm133_vm0, %v32_v42  ;;  %v40_v42 = vld [vmem:[%s1000_s5] sm:$0x1] }
  0x4b   :  { %616 = vmatprep.mubr.msk.f32.mxu0 %vm133_vm0, %v33_v43  ;;  %v113_v43 = vlaneseq }
  0x4e   :  { %617 = vmatmul.mubr.msk.f32.gmra.mrb[4].mxu0 %vm133_vm0, %v34_v44  ;;  %v114_v44 = vshrl.u32 %v113_v43, 7 }
  0x85   :  { %v60_v48 = vpop.permute.xlu1 %59 }
  0x86   :  { %v50_v47 = vpop.permute.xlu0 %49 }
  0x89   :  { %v65_v53 = vpop.permute.xlu1 %64 }
  0x8a   :  { %v55_v49 = vpop.permute.xlu0 %54 }
  0x8d   :  { %v75_v63 = vpop.permute.xlu1 %74 }
  0x8e   :  { %v70_v2 = vpop.permute.xlu0 %69 }
  0x91   :  { %v90_v19 = vpop.permute.xlu1 %89 }
  0x92   :  { %v85_v17 = vpop.permute.xlu0 %84 }
  0x95   :  { %v100_v30 = vpop.permute.xlu1 %99 }
  0x96   :  { %v95_v28 = vpop.permute.xlu0 %94 }
  0x9a   :  { %v105_v36 = vpop.permute.xlu0 %104 }
 0x119   :  { %v612_v50 = vpop.f32.mrb[0].mxu0 }
 0x11a   :  { %v272_v51 = vadd.f32 %v612_v50, %v55_v49  ;;  %v266_v52 = vpop.f32.mrb[1].mxu0 }
 0x11b   :  { %v267_v54 = vadd.f32 %v266_v52, %v50_v47  ;;  %v111_v47 = vpop.permute.xlu1 %110 }
 0x11c   :  { %v296_v55 = vmax.f32 %v272_v51, 0.0 }
 0x11d   :  { %v295_v56 = vmax.f32 %v267_v54, 0.0  ;;  %v615_v57 = vpop.f32.mrb[2].mxu0 }
 0x11e   :  { %v282_v58 = vadd.f32 %v615_v57, %v65_v53  ;;  %v276_v59 = vpop.f32.mrb[3].mxu0 }
 0x11f   :  { %v277_v60 = vadd.f32 %v276_v59, %v60_v48  ;;  %v708_v61 = vpack.c.bf16 %v296_v55, %v295_v56 }
 0x120   :  { %v298_v62 = vmax.f32 %v282_v58, 0.0 }
 0x121   :  { %v297_v0 = vmax.f32 %v277_v60, 0.0  ;;  %v618_v1 = vpop.f32.mrb[4].mxu0  ;;  %709 = vmatpush3.bf16.msra.mxu1 %v708_v61 }
 0x122   :  { %v292_v3 = vadd.f32 %v618_v1, %v75_v63  ;;  %v286_v4 = vpop.f32.mrb[5].mxu0  ;;  %710 = vmatprep.subr.bf16.mxu1 %v756_v45 }
 0x123   :  { %v711_v5 = vpack.c.bf16 %v298_v62, %v297_v0  ;;  %v287_v6 = vadd.f32 %v286_v4, %v70_v2 }
 0x124   :  { %v300_v7 = vmax.f32 %v292_v3, 0.0 }
 0x125   :  { %v299_v8 = vmax.f32 %v287_v6, 0.0  ;;  %712 = vmatpush3.bf16.msra.mxu1 %v711_v5 }
 0x126   :  { %713 = vmatprep.subr.bf16.mxu1 %v756_v45 }
 0x127   :  { %v714_v9 = vpack.c.bf16 %v300_v7, %v299_v8 }
 0x129   :  { %716 = vmatpush3.bf16.msk.msra.mxu1 %vm715_vm5, %v714_v9 }
 0x12a   :  { %717 = vmatprep.subr.bf16.mxu1 %v756_v45 }
 0x12c   :  { %632 = vmatmul.mubr.msk.f32.vlgmr.msra.gmra.mrb[0].mxu1 %vm301_vm6, %v35_v10 }
 0x12d   :  { %634 = vmatprep.mubr.msk.f32.mxu1 %vm757_vm2, %v758_v46 }
 0x130   :  { %635 = vmatmul.mubr.msk.f32.gmra.mrb[2].mxu1 %vm301_vm6, %v36_v11 }
 0x131   :  { %637 = vmatprep.mubr.msk.f32.mxu1 %vm757_vm2, %v758_v46 }
 0x134   :  { %638 = vmatmul.mubr.msk.f32.gmra.mrb[4].mxu1 %vm301_vm6, %v37_v12 }
 0x135   :  { %640 = vmatprep.mubr.msk.f32.mxu1 %vm757_vm2, %v758_v46 }
 0x138   :  { %641 = vmatmul.mubr.msk.f32.gmra.mrb[6].mxu1 %vm301_vm6, %v38_v13 }
 0x139   :  { %643 = vmatprep.mubr.msk.f32.mxu1 %vm757_vm2, %v758_v46 }
 0x13c   :  { %644 = vmatmul.mubr.msk.f32.gmra.mrb[8].mxu1 %vm301_vm6, %v39_v14 }
 0x13d   :  { %656 = vmatprep.mubr.msk.f32.mxu1 %vm757_vm2, %v758_v46 }
 0x1ff   :  { %v387_v15 = vpop.f32.mrb[0].mxu1 }
 0x200   :  { %v633_v16 = vpop.f32.mrb[1].mxu1  ;;  %v388_v18 = vadd.f32 %v387_v15, %v85_v17 }
 0x202   :  { %v411_v23 = vmax.f32 %v388_v18, 0.0 }
 0x203   :  { %v392_v20 = vpop.f32.mrb[2].mxu1 }
 0x204   :  { %v393_v21 = vadd.f32 %v392_v20, %v90_v19  ;;  %v636_v22 = vpop.f32.mrb[3].mxu1 }
 0x206   :  { %v412_v24 = vmax.f32 %v393_v21, 0.0 }
 0x207   :  { %v397_v25 = vpop.f32.mrb[4].mxu1 }
 0x208   :  { %v718_v26 = vpack.c.bf16 %v412_v24, %v411_v23  ;;  %v639_v27 = vpop.f32.mrb[5].mxu1  ;;  %v398_v29 = vadd.f32 %v397_v25, %v95_v28 }
 0x20a   :  { %719 = vmatpush3.bf16.msra.mxu1 %v718_v26  ;;  %v413_v34 = vmax.f32 %v398_v29, 0.0 }
 0x20b   :  { %v402_v31 = vpop.f32.mrb[6].mxu1  ;;  %720 = vmatprep.subr.bf16.mxu1 %v756_v45  ;;  %v115_v45 = vsub.s32 0, %v114_v44 }
 0x20c   :  { %v403_v32 = vadd.f32 %v402_v31, %v100_v30  ;;  %v642_v33 = vpop.f32.mrb[7].mxu1 }
 0x20d   :  { %v116_v48 = vrot.slane %v111_v47, %v115_v45 }
 0x20e   :  { %v414_v35 = vmax.f32 %v403_v32, 0.0 }
 0x20f   :  { %v407_v37 = vpop.f32.mrb[8].mxu1 }
 0x210   :  { %v721_v38 = vpack.c.bf16 %v414_v35, %v413_v34  ;;  %v408_v39 = vadd.f32 %v407_v37, %v105_v36  ;;  %v645_v40 = vpop.f32.mrb[9].mxu1 }
 0x212   :  { %722 = vmatpush3.bf16.msra.mxu1 %v721_v38  ;;  %v415_v41 = vmax.f32 %v408_v39, 0.0 }
 0x213   :  { %654 = vmatprep.subr.mxu1 %v758_v46 }
 0x216   :  { %655 = vmatpush3.msk.msra.mxu1 %vm420_vm7, %v415_v41 }
 0x217   :  { %657 = vmatmul.mubr.msk.f32.vlgmr.msra.gmra.mrb[10].mxu1 %vm416_vm8, %v40_v42 }
 0x2ea   :  { %v490_v49 = vpop.f32.mrb[10].mxu1 }
 0x2eb   :  { %v491_v50 = vadd.f32 %v490_v49, %v116_v48  ;;  %v658_v51 = vpop.f32.mrb[11].mxu1 }
 0x2ed   :  { %494 = vst [vmem:[#allocation3] sm:$0x1] %v491_v50 }
 0x2ee   :  { %742 = shalt.err (!%p739_p4)
}
 0x2ef   :  { %s743_s30 = scalar_lea.hbm %s1002_s7, 16 }
 0x2f0   :  { %p744_p5 = scmp.ne.s32.totalorder %s1002_s7, %s743_s30  ;;  %p747_p6 = scmp.lt.u32.totalorder %s743_s30, %s1002_s7 }
 0x2f2   :  { %p749_p7 = pnand %p747_p6, %p744_p5 }
 0x2f4   :  { %752 = shalt.err (!%p749_p7)
}
 0x2f5   :  { %504 = dma.vmem_to_hbm [thread:$0]  %s502_s26, 16, %s1002_s7, [#allocation4]  }
 0x2f6   :  { %753 = dma.done.wait [#allocation4], 16  }
 0x2f7   :  { %754 = vsyncadd [#allocation4], 4294967280 }
 0x2f8   :  { %508 = vsyncpa [#allocation4], 1 }

</bundles_post_ra>
